<compile_context>
chip_gen: v5e
topology: v5e:2x2
jax: 0.10.0
libtpu: 0.0.40
codegen_flags: <defaults>
</compile_context>

<pallas_src>
import jax
import jax.numpy as jnp
from jax import lax
from jax.experimental import pallas as pl
from jax.experimental.pallas import tpu as pltpu


def _texture_loss_kernel(out_ref, tgt_ref, loss_ref, diff_ref):
    """One (batch, hw-chunk) grid step.

    out_ref / tgt_ref : (1, C, TK) VMEM tiles of the flattened feature maps.
    loss_ref          : (1, 1) scalar accumulator, resident across the grid.
    diff_ref          : (C, C) f32 scratch accumulating X.X^T - Y.Y^T over HW.
    """
    b = pl.program_id(0)
    k = pl.program_id(1)
    last_k = pl.num_programs(1) - 1  # static grid -> plain Python int

    @pl.when((b == 0) & (k == 0))
    def _():
        loss_ref[...] = jnp.zeros_like(loss_ref)

    @pl.when(k == 0)
    def _():
        diff_ref[...] = jnp.zeros_like(diff_ref)

    x = out_ref[0]  # (C, TK), input dtype; MXU accumulates in f32
    y = tgt_ref[0]  # (C, TK)
    # Contract the last (lane/HW) axis of both operands: lane-dense MXU feed,
    # no transpose of the HW-major operand.
    dn = (((1,), (1,)), ((), ()))
    g_x = lax.dot_general(x, x, dimension_numbers=dn,
                          preferred_element_type=jnp.float32)
    g_y = lax.dot_general(y, y, dimension_numbers=dn,
                          preferred_element_type=jnp.float32)
    diff_ref[...] += g_x - g_y

    @pl.when(k == last_k)
    def _():
        d = diff_ref[...]
        loss_ref[...] += jnp.sum(d * d)


def _pick_hw_tile(hw, c, itemsize, target_tile_bytes=12 * (1 << 20)):
    """Largest multiple-of-128 divisor of hw whose (C, tk) tile fits the budget.

    Sized so 2 inputs x 2 pipeline buffers stay well under the v7x 64 MiB VMEM
    part; falls back to the full HW extent when it is not 128-aligned.
    """
    max_tk = max(128, target_tile_bytes // max(1, c * itemsize))
    best = None
    tk = 128
    while tk <= hw:
        if hw % tk == 0 and tk <= max_tk:
            best = tk
        tk += 128
    return best if best is not None else hw


def texture_loss(output, target):
    """Pallas TPU TextureLoss. output, target: (B, C, H, W). Returns scalar f32."""
    assert output.shape == target.shape
    b, c, h, w = output.shape
    hw = h * w
    out_flat = output.reshape(b, c, hw)
    tgt_flat = target.reshape(b, c, hw)

    itemsize = jnp.dtype(output.dtype).itemsize
    tk = _pick_hw_tile(hw, c, itemsize)
    num_k = hw // tk

    in_spec = pl.BlockSpec((1, c, tk), lambda i, k: (i, 0, k))

    # 2 inputs x 2 pipeline buffers x (C, tk) tile + (C, C) scratch + slack.
    tile_bytes = c * tk * itemsize
    vmem_bytes = int(min(100 * (1 << 20),
                         max(16 * (1 << 20),
                             4 * tile_bytes + c * c * 4 + (2 << 20))))

    # TODO(synk): on v7x, shard the batch axis across the 2 TensorCores
    # (grid=(2, B//2, K), per-core partial-sum outputs) for up to ~2x; kept
    # single-accumulator here for correctness across all generations.
    raw = pl.pallas_call(
        _texture_loss_kernel,
        out_shape=jax.ShapeDtypeStruct((1, 1), jnp.float32),
        grid_spec=pltpu.PrefetchScalarGridSpec(
            num_scalar_prefetch=0,
            grid=(b, num_k),
            in_specs=[in_spec, in_spec],
            out_specs=pl.BlockSpec((1, 1), lambda i, k: (0, 0)),
            scratch_shapes=[pltpu.VMEM((c, c), jnp.float32)],
        ),
        compiler_params=pltpu.CompilerParams(
            dimension_semantics=("arbitrary", "arbitrary"),
            vmem_limit_bytes=vmem_bytes,
        ),
    )(out_flat, tgt_flat)

    # All normalization applied once, at trace time (no in-kernel num_programs
    # arithmetic, no per-step inv_norm multiplies):
    #   gram scaling 1/(C*H*W) on each gram -> squared on the diff,
    #   MSE mean over B*C*C elements.
    inv_norm = 1.0 / float(c * h * w)
    scale = (inv_norm * inv_norm) / float(b * c * c)
    return raw[0, 0] * scale


def _texture_loss_ref(output, target):
    b, c, h, w = output.shape
    f_o = output.reshape(b, c, h * w).astype(jnp.float32)
    f_t = target.reshape(b, c, h * w).astype(jnp.float32)
    g_o = jnp.einsum("bij,bkj->bik", f_o, f_o) / (c * h * w)
    g_t = jnp.einsum("bij,bkj->bik", f_t, f_t) / (c * h * w)
    return jnp.mean((g_o - g_t) ** 2)


if __name__ == "__main__":
    key = jax.random.PRNGKey(0)
    k1, k2 = jax.random.split(key)
    B, C, H, W = 2, 4, 16, 16
    output = jax.random.normal(k1, (B, C, H, W), dtype=jnp.float32)
    target = jax.random.normal(k2, (B, C, H, W), dtype=jnp.float32)

    loss = jax.block_until_ready(texture_loss(output, target))
    ref = jax.block_until_ready(_texture_loss_ref(output, target))

    assert jnp.allclose(loss, ref, rtol=1e-5, atol=1e-7), (loss, ref)
    print("KERNEL_OK")
</pallas_src>

<mosaic_0001>
module attributes {stable_mosaic.version = 11 : i64} {
  func.func @_texture_loss_kernel(%arg0: i32, %arg1: i32, %arg2: memref<1x4x256xf32, #tpu.memory_space<vmem>>, %arg3: memref<1x4x256xf32, #tpu.memory_space<vmem>>, %arg4: memref<1x1xf32, #tpu.memory_space<vmem>>, %arg5: memref<4x4xf32, #tpu.memory_space<vmem>>) attributes {dimension_semantics = [#tpu.dimension_semantics<arbitrary>, #tpu.dimension_semantics<arbitrary>], iteration_bounds = array<i64: 2, 1>, scalar_prefetch = 0 : i64, scratch_operands = 1 : i64, tpu.core_type = #tpu.core_type<tc>, window_params = [{transform_indices = @transform_0, window_bounds = array<i64: 1, 4, 256>}, {transform_indices = @transform_1, window_bounds = array<i64: 1, 4, 256>}, {pipeline_mode = #tpu.pipeline_mode<synchronous>, transform_indices = @transform_2, window_bounds = array<i64: 1, 1>}]} {
    %c0_i32 = arith.constant 0 : i32
    %0 = arith.cmpi eq, %arg0, %c0_i32 : i32
    %c0_i32_0 = arith.constant 0 : i32
    %1 = arith.cmpi eq, %arg1, %c0_i32_0 : i32
    %2 = arith.andi %0, %1 : i1
    %3 = arith.extui %2 : i1 to i32
    %c0_i32_1 = arith.constant 0 : i32
    %4 = arith.cmpi ne, %3, %c0_i32_1 : i32
    scf.if %4 {
      %cst_16 = arith.constant 0.000000e+00 : f32
      %21 = vector.broadcast %cst_16 : f32 to vector<1x1xf32>
      %c0_17 = arith.constant 0 : index
      %c0_18 = arith.constant 0 : index
      %22 = vector.load %arg4[%c0_17, %c0_18] : memref<1x1xf32, #tpu.memory_space<vmem>>, vector<1x1xf32>
      tpu.vector_store %arg4[%c0_17, %c0_18], %21 {strides = array<i32>} : memref<1x1xf32, #tpu.memory_space<vmem>>, vector<1x1xf32>,
    } else {
    }
    %c0_i32_2 = arith.constant 0 : i32
    %5 = arith.cmpi eq, %arg1, %c0_i32_2 : i32
    %6 = arith.extui %5 : i1 to i32
    %c0_i32_3 = arith.constant 0 : i32
    %7 = arith.cmpi ne, %6, %c0_i32_3 : i32
    scf.if %7 {
      %cst_16 = arith.constant 0.000000e+00 : f32
      %21 = vector.broadcast %cst_16 : f32 to vector<4x4xf32>
      %c0_17 = arith.constant 0 : index
      %c0_18 = arith.constant 0 : index
      %22 = vector.load %arg5[%c0_17, %c0_18] : memref<4x4xf32, #tpu.memory_space<vmem>>, vector<4x4xf32>
      tpu.vector_store %arg5[%c0_17, %c0_18], %21 {strides = array<i32>} : memref<4x4xf32, #tpu.memory_space<vmem>>, vector<4x4xf32>,
    } else {
    }
    %c0 = arith.constant 0 : index
    %c0_4 = arith.constant 0 : index
    %c0_5 = arith.constant 0 : index
    %8 = vector.load %arg2[%c0, %c0_4, %c0_5] : memref<1x4x256xf32, #tpu.memory_space<vmem>>, vector<1x4x256xf32>
    %9 = vector.shape_cast %8 : vector<1x4x256xf32> to vector<4x256xf32>
    %c0_6 = arith.constant 0 : index
    %c0_7 = arith.constant 0 : index
    %c0_8 = arith.constant 0 : index
    %10 = vector.load %arg3[%c0_6, %c0_7, %c0_8] : memref<1x4x256xf32, #tpu.memory_space<vmem>>, vector<1x4x256xf32>
    %11 = vector.shape_cast %10 : vector<1x4x256xf32> to vector<4x256xf32>
    %cst = arith.constant dense<0.000000e+00> : vector<4x4xf32>
    %12 = tpu.matmul %9, %9, %cst {dimension_numbers = #tpu.dot_dimension_numbers<[1], [1], [0], [0], [0, 0, 1, 0], [], []>} : vector<4x256xf32>, vector<4x256xf32>, vector<4x4xf32> -> vector<4x4xf32>
    %cst_9 = arith.constant dense<0.000000e+00> : vector<4x4xf32>
    %13 = tpu.matmul %11, %11, %cst_9 {dimension_numbers = #tpu.dot_dimension_numbers<[1], [1], [0], [0], [0, 0, 1, 0], [], []>} : vector<4x256xf32>, vector<4x256xf32>, vector<4x4xf32> -> vector<4x4xf32>
    %c0_10 = arith.constant 0 : index
    %c0_11 = arith.constant 0 : index
    %14 = vector.load %arg5[%c0_10, %c0_11] : memref<4x4xf32, #tpu.memory_space<vmem>>, vector<4x4xf32>
    %15 = arith.subf %12, %13 : vector<4x4xf32>
    %16 = arith.addf %14, %15 : vector<4x4xf32>
    %c0_12 = arith.constant 0 : index
    %c0_13 = arith.constant 0 : index
    %17 = vector.load %arg5[%c0_12, %c0_13] : memref<4x4xf32, #tpu.memory_space<vmem>>, vector<4x4xf32>
    tpu.vector_store %arg5[%c0_12, %c0_13], %16 {strides = array<i32>} : memref<4x4xf32, #tpu.memory_space<vmem>>, vector<4x4xf32>,
    %c0_i32_14 = arith.constant 0 : i32
    %18 = arith.cmpi eq, %arg1, %c0_i32_14 : i32
    %19 = arith.extui %18 : i1 to i32
    %c0_i32_15 = arith.constant 0 : i32
    %20 = arith.cmpi ne, %19, %c0_i32_15 : i32
    scf.if %20 {
      %c0_16 = arith.constant 0 : index
      %c0_17 = arith.constant 0 : index
      %21 = vector.load %arg5[%c0_16, %c0_17] : memref<4x4xf32, #tpu.memory_space<vmem>>, vector<4x4xf32>
      %c0_18 = arith.constant 0 : index
      %c0_19 = arith.constant 0 : index
      %22 = vector.load %arg4[%c0_18, %c0_19] : memref<1x1xf32, #tpu.memory_space<vmem>>, vector<1x1xf32>
      %23 = arith.mulf %21, %21 : vector<4x4xf32>
      %24 = vector.shape_cast %23 : vector<4x4xf32> to vector<1x4x4xf32>
      %cst_20 = arith.constant dense<0.000000e+00> : vector<1xf32>
      %25 = vector.multi_reduction <add>, %24, %cst_20 [1, 2] : vector<1x4x4xf32> to vector<1xf32>
      %26 = vector.shape_cast %25 : vector<1xf32> to vector<1x1x1xf32>
      %27 = vector.extract %26[0, 0, 0] : f32 from vector<1x1x1xf32>
      %28 = vector.broadcast %27 : f32 to vector<1x1xf32>
      %29 = arith.addf %22, %28 : vector<1x1xf32>
      %c0_21 = arith.constant 0 : index
      %c0_22 = arith.constant 0 : index
      %30 = vector.load %arg4[%c0_21, %c0_22] : memref<1x1xf32, #tpu.memory_space<vmem>>, vector<1x1xf32>
      tpu.vector_store %arg4[%c0_21, %c0_22], %29 {strides = array<i32>} : memref<1x1xf32, #tpu.memory_space<vmem>>, vector<1x1xf32>,
    } else {
    }
    return
  }
  func.func @transform_0(%arg0: i32, %arg1: i32) -> (i32, i32, i32) {
    %c0_i32 = arith.constant 0 : i32
    %c0_i32_0 = arith.constant 0 : i32
    return %arg0, %c0_i32, %arg1 : i32, i32, i32
  }
  func.func @transform_1(%arg0: i32, %arg1: i32) -> (i32, i32, i32) {
    %c0_i32 = arith.constant 0 : i32
    %c0_i32_0 = arith.constant 0 : i32
    return %arg0, %c0_i32, %arg1 : i32, i32, i32
  }
  func.func @transform_2(%arg0: i32, %arg1: i32) -> (i32, i32) {
    %c0_i32 = arith.constant 0 : i32
    %c0_i32_0 = arith.constant 0 : i32
    %c0_i32_1 = arith.constant 0 : i32
    return %c0_i32, %c0_i32_0 : i32, i32
  }
}

</mosaic_0001>

<bundles_post_ra>
// kernel: tpu_custom_call.1
= control target key start
LH: loop header
LB: loop body
LE: loop exit
PB: predicated region body
PF: predicated region fallthrough
CT: control target
= control target key end

     0   :  { %7 = vsyncpa [#allocation4], 0  ;;  %s806_s0 = inlined_call_operand.hbm [shape: f32[2,4,256], index: 0, kind: input, shape index: {}]   ;;  %s807_s1 = inlined_call_operand.hbm [shape: f32[2,4,256], index: 1, kind: input, shape index: {}]   ;;  %s808_s2 = inlined_call_operand.hbm [shape: f32[1,1], index: 2, kind: output, shape index: {}]  }
   0x1   :  { %9 = vsyncpa [#allocation4 + $0x1], 0 }
   0x2   :  { %10 = vsyncpa [#allocation7], 0 }
   0x3   :  { %12 = vsyncpa [#allocation7 + $0x1], 0 }
   0x4   :  { %13 = vsyncpa [#allocation5], 0  ;;  %s708_s9 = smov 0   ;;  %s710_s10 = smov 0  }
   0x5   :  { %s712_s11 = smov 0   ;;  %s714_s12 = smov 0  }
   0x6   :  { %s716_s13 = smov 0   ;;  %s718_s14 = smov 0  }
   0x7 LB: > { %s451_s15 = sadd.s32 4294967295, %s688_s14   ;;  %s31_s16 = sadd.s32 1, %s684_s13  ;;  %s688_s14 = sphi %s718_s14, %s19_s14   ;;  %s684_s13 = sphi %s716_s13, %s815_s13   ;;  %s680_s12 = sphi %s714_s12, %s814_s12   ;;  %s676_s11 = sphi %s712_s11, %s813_s11   ;;  %s672_s10 = sphi %s710_s10, %s812_s10   ;;  %s668_s9 = sphi %s708_s9, %s811_s9  }
   0x8   : > { %p33_p0 = scmp.ge.s32.totalorder %s31_s16, 2  ;;  %s40_s17 = sadd.s32 1, %s676_s11 }
   0x9   : > { %p47_p1 = scmp.ne.s32.totalorder %s676_s11, %s672_s10  ;;  %p48_p2 = scmp.eq.s32.totalorder %s688_s14, 0 }
   0xa   : > { %s817_s16 = smov (%p33_p0, %s31_s16), 0  ;;  %p53_p4 = scmp.ne.s32.totalorder %s672_s10, %s668_s9 }
   0xb   : > { %p744_p3 = por %p48_p2, %p47_p1  ;;  %s35_s19 = ssub.s32 %s684_s13, %s817_s16 }
   0xc   : > { %p54_p5 = scmp.eq.s32.totalorder %s451_s15, 0  ;;  %p38_p6 = scmp.eq.s32.totalorder %s35_s19, 0 }
   0xd   : > { %p488_p8 = scmp.lt.s32.totalorder %s688_s14, 2  ;;  %s126_s22 = sand.u32 1, %s676_s11  }
   0xe   : > { %p753_p7 = por %p54_p5, %p53_p4  ;;  %s468_s23 = sshll.u32 %s684_s13, 3 }
   0xf   : > { %s759_s21 = scalar_select %p38_p6, %s676_s11, %s40_s17  }
  0x10   : > { %s454_s24 = sshll.u32 %s126_s22, 3  ;;  %s137_s27 = scalar_lea.hbm %s806_s0, %s468_s23 }
  0x11   : > { %s139_s28 = sshll.u32 %s137_s27, 4  ;;  %s130_s29 = scalar_lea.vmem [#allocation3], %s454_s24  ;;  %s140_s28 = int_to_ptr.hbm [resolvable:$true] %s139_s28 }
  0x12   : > { %s141_s30 = sshll.u32 %s130_s29, 4  ;;  %p482_p9 = pnand %p488_p8, %p744_p3  ;;  %s142_s30 = int_to_ptr.vmem [resolvable:$true] %s141_s30 }
  0x13   : > { %p460_p10 = scmp.ge.s32.totalorder %s688_s14, 1  ;;  %p168_p11 = scmp.lt.s32.totalorder %s688_s14, 3 }
  0x14   : > { %s127_s3 = scalar_lea.sflag [#allocation4], %s126_s22  ;;  %s159_s6 = scalar_lea.hbm %s807_s1, %s468_s23 }
  0x15   : > { %484 = dma.hbm_to_vmem [thread:$0]  (!%p482_p9), %s140_s28, 128, %s142_s30, %s127_s3  }
  0x16   : > { %p169_p12 = pnand %p460_p10, %p168_p11  ;;  %s161_s7 = sshll.u32 %s159_s6, 4  ;;  %s162_s7 = int_to_ptr.hbm [resolvable:$true] %s161_s7 }
  0x17   : > { %s152_s8 = scalar_lea.vmem [#allocation6], %s454_s24  ;;  %s149_s17 = scalar_lea.sflag [#allocation7], %s126_s22 }
  0x18   : > { %s163_s9 = sshll.u32 %s152_s8, 4  ;;  %172 = sbr.rel (%p169_p12) target bundleno = 409 (0x199), region = 28  ;;  %s164_s9 = int_to_ptr.vmem [resolvable:$true] %s163_s9 }
  0x19   : > { %487 = dma.hbm_to_vmem [thread:$0]  (!%p482_p9), %s162_s7, 128, %s164_s9, %s149_s17  }
  0x1a   : > { %s174_s18 = sand.u32 (!%p169_p12), 1, %s672_s10  }
  0x1b   : > { %s461_s19 = sshll.u32 (!%p169_p12), %s174_s18, 3  ;;  %s175_s25 = scalar_lea.sflag (!%p169_p12), [#allocation4], %s174_s18 }
  0x1c   : > { %s178_s26 = scalar_lea.vmem (!%p169_p12), [#allocation3], %s461_s19 }
  0x1d   : > { %655 = dma.done.wait (%p753_p7), %s175_s25, 128  }
  0x1e   : > { %657 = vsyncadd (%p753_p7), %s175_s25, 4294967168  ;;  %s185_s23 = scalar_lea.sflag [#allocation7], %s174_s18  ;;  %s188_s24 = scalar_lea.vmem [#allocation6], %s461_s19 }
  0x1f   : > { %659 = dma.done.wait (%p753_p7), %s185_s23, 128  }
  0x20   : > { %661 = vsyncadd (%p753_p7), %s185_s23, 4294967168  ;;  %p212_p13 = scmp.eq.s32.totalorder %s680_s12, 0 }
  0x21   : > { %vm218_vm0 = vcmask (%p212_p13), 0   ;;  %v690_v0 = vmov (%p212_p13), 0.0  }
  0x22   : > { %217 = sbr.rel (!%p212_p13) target bundleno = 39 (0x27), region = 40  ;;  %219 = vst.msk [vmem:[#allocation8] sm:$0x1] (%p212_p13), %vm218_vm0, %v690_v0 }
  0x27 PF: > { %v225_v1 = vld [vmem:[%s178_s26] sm:$0xff]  ;;  %v226_v4 = vld [vmem:[%s188_s24] sm:$0xff]  ;;  %vm223_vm1 = vcmask 27648   ;;  %v691_v11 = vmov 0.0   ;;  %s692_s12 = smov [#allocation8]   ;;  %s362_s28 = sshll.u32 %s808_s2, 4  ;;  %s363_s28 = int_to_ptr.hbm [resolvable:$true] %s362_s28 }
  0x28   : > { %228 = vst [vmem:[#allocation1] ss:$2 sm:$0xff] %v225_v1  ;;  %s360_s20 = sshll.u32 %s692_s12, 4  ;;  %vm352_vm2 = vcmask 0   ;;  %p489_p0 = scmp.eq.s32.totalorder %s451_s15, 1  ;;  %s361_s20 = int_to_ptr.vmem [resolvable:$true] %s360_s20 }
  0x29   : > { %224 = vst.msk [vmem:[#allocation2] sm:$0xf] %vm223_vm1, %v691_v11  ;;  %v338_v31 = vld [vmem:[#allocation8] sm:$0x1] }
  0x2f   : > { %v229_v2 = vld.sshfl [vmem:[#allocation1] sm:$0xff pattern:$0x75316420]  ;;  %v230_v3 = vld.sshfl [vmem:[#allocation1 + $0x8] sm:$0xff pattern:$0x75316420] }
  0x30   : > { %233 = vst [vmem:[#allocation1] ss:$2 sm:$0xff] %v225_v1  ;;  %v329_v18 = vld [vmem:[#allocation2] sm:$0xf] }
  0x37   : > { %v234_v5 = vld.sshfl [vmem:[#allocation1] sm:$0xff pattern:$0x75316420]  ;;  %v235_v6 = vld.sshfl [vmem:[#allocation1 + $0x8] sm:$0xff pattern:$0x75316420] }
  0x38   : > { %279 = vst [vmem:[#allocation1] ss:$2 sm:$0xff] %v226_v4  ;;  %253 = vmatpush.xpose.msra.mxu0 %v234_v5  ;;  %273 = vmatpush.xpose.msra.mxu1 %v235_v6 }
  0x3b   : > { %254 = vmatmul.f32.vlgmr.msra.gmra.mxu0 %v229_v2  ;;  %274 = vmatmul.f32.vlgmr.msra.gmra.mxu1 %v230_v3 }
  0x3f   : > { %v280_v7 = vld.sshfl [vmem:[#allocation1] sm:$0xff pattern:$0x75316420]  ;;  %v281_v8 = vld.sshfl [vmem:[#allocation1 + $0x8] sm:$0xff pattern:$0x75316420] }
  0x40   : > { %284 = vst [vmem:[#allocation1] ss:$2 sm:$0xff] %v226_v4 }
  0x47   : > { %v285_v9 = vld.sshfl [vmem:[#allocation1] sm:$0xff pattern:$0x75316420]  ;;  %v286_v10 = vld.sshfl [vmem:[#allocation1 + $0x8] sm:$0xff pattern:$0x75316420] }
  0x48   : > { %304 = vmatpush.xpose.msra.mxu2 %v285_v9  ;;  %324 = vmatpush.xpose.msra.mxu3 %v286_v10 }
  0x4b   : > { %305 = vmatmul.f32.vlgmr.msra.gmra.mxu2 %v280_v7  ;;  %325 = vmatmul.f32.vlgmr.msra.gmra.mxu3 %v281_v8 }
  0xb8   : > { %v255_v12 = vpop.f32.mrf.mxu0  ;;  %v275_v13 = vpop.f32.mrf.mxu1 }
  0xb9   : > { %v276_v14 = vadd.f32 %v275_v13, %v255_v12 }
  0xce   : > { %v306_v15 = vpop.f32.mrf.mxu2  ;;  %v326_v16 = vpop.f32.mrf.mxu3 }
  0xcf   : > { %v327_v17 = vadd.f32 %v326_v16, %v306_v15 }
  0xd1   : > { %v330_v19 = vsub.f32 %v276_v14, %v327_v17 }
  0xd3   : > { %v331_v20 = vadd.f32 %v330_v19, %v329_v18 }
  0xd5   : > { %333 = vst.msk [vmem:[#allocation2] sm:$0xf] %vm223_vm1, %v331_v20 }
  0xdc   : > { %v337_v21 = vld [vmem:[#allocation2] sm:$0xf] }
  0xdd   : > { %v339_v22 = vmul.f32 %v337_v21, %v337_v21 }
  0xdf   : > { %v340_v23 = vsel %vm223_vm1, %v339_v22, 0.0 }
  0xe0   : > { %341 = vadd.xlane.f32.xlu0 %v340_v23 }
 0x153   : > { %v342_v24 = vpop.xlane.xlu0 %341 }
 0x154   : > { %v343_v25 = vrot.slane %v342_v24, 4 }
 0x156   : > { %v344_v26 = vadd.f32 %v343_v25, %v342_v24 }
 0x158   : > { %v345_v27 = vrot.slane %v344_v26, 2 }
 0x15a   : > { %v346_v28 = vadd.f32 %v345_v27, %v344_v26 }
 0x15c   : > { %v347_v29 = vrot.slane %v346_v28, 1 }
 0x15e   : > { %v348_v30 = vadd.f32 %v347_v29, %v346_v28 }
 0x160   : > { %471 = vpush %v348_v30 }
 0x191   : > { %s472_s29 = spop %471 }
 0x192   : > { %v350_v32 = vstv %s472_s29 }
 0x193   : > { %v351_v33 = vadd.f32 %v350_v32, %v338_v31 }
 0x195   : > { %353 = vst.msk [vmem:[#allocation8] sm:$0x1] %vm352_vm2, %v351_v33 }
 0x196   : > { %478 = dma.vmem_to_hbm [thread:$0]  (%p489_p0), %s361_s20, 16, %s363_s28, [#allocation5]  }
 0x197   : > { %663 = dma.done.wait (%p489_p0), [#allocation5], 16  }
 0x198   : > { %665 = vsyncadd (%p489_p0), [#allocation5], 4294967280 }
 0x199 PF: > { %s19_s14 = sadd.s32 1, %s688_s14   ;;  %s811_s9 = smov %s672_s10 }
 0x19a   : > { %p16_p1 = scmp.ge.s32.totalorder %s19_s14, 4   ;;  %s812_s10 = smov %s676_s11 }
 0x19b   : > { %s813_s11 = smov %s759_s21  ;;  %s814_s12 = smov %s684_s13 }
 0x19c   : > { %s815_s13 = smov %s817_s16  ;;  %18 = sbr.rel (!%p16_p1) target bundleno = 7 (0x7), region = 90 }
 0x1a1   :  { %376 = vsyncpa [#allocation4], 1 }
 0x1a2   :  { %378 = vsyncpa [#allocation4 + $0x1], 1 }
 0x1a3   :  { %379 = vsyncpa [#allocation7], 1 }
 0x1a4   :  { %381 = vsyncpa [#allocation7 + $0x1], 1 }
 0x1a5   :  { %382 = vsyncpa [#allocation5], 1 }
 0x1a6   :  { %384 = vsyncpa [#allocation5 + $0x1], 1 }

</bundles_post_ra>
